<compile_context>
chip_gen: v5e
topology: v5e:2x2
jax: 0.10.0
libtpu: 0.0.40
codegen_flags: <defaults>
</compile_context>

<pallas_src>
import functools
import math

import jax
import jax.numpy as jnp
from jax.experimental import pallas as pl
from jax.experimental.pallas import tpu as pltpu


# Caps chosen to be safe on v7x (64 MiB physical VMEM / TensorCore) as well as
# v5e / v6e (128 MiB).
_FUSED_VMEM_CAP = 40 * 1024 * 1024   # max estimated footprint for the fused path
_VMEM_HARD_CAP = 56 * 1024 * 1024    # never request more scoped VMEM than this
_VMEM_FLOOR = 32 * 1024 * 1024       # never request less than the usual default


def _sublane_multiple(dtype):
    # Sub-32-bit dtypes pack along sublanes: native tile heights are
    # 8 (f32), 16 (bf16/f16), 32 (int8/fp8).
    return max(8, 32 // jnp.dtype(dtype).itemsize)


def _pick_tiles(rows, hw, dtype, target_bytes):
    """Pick (row_tile, lane_tile) for a (rows, hw) view of x.

    Each tile dim is either aligned to the hardware tiling (rows to the
    dtype-native sublane multiple, lanes to 128) or equals the full extent.
    """
    itemsize = jnp.dtype(dtype).itemsize
    sub = _sublane_multiple(dtype)
    # Lane (last) dim: full extent when modest, otherwise a multiple of 128.
    if hw <= 16384:
        t_hw = hw
    else:
        t_hw = 16384
    # Sublane dim: full extent when small, else a dtype-native multiple sized
    # so one block is roughly `target_bytes` (amortizes ~0.35us/step overhead).
    if rows <= sub:
        t_rows = rows
    else:
        want = max(sub, (target_bytes // max(1, t_hw * itemsize)) // sub * sub)
        t_rows = max(sub, min(want, (rows // sub) * sub))
    return t_rows, t_hw


def _vmem_limit(footprint_bytes):
    return int(min(_VMEM_HARD_CAP, max(_VMEM_FLOOR, footprint_bytes)))


# ---------------------------------------------------------------------------
# Fused single-pass kernel: pool + gate + excite for one image per grid step.
# ---------------------------------------------------------------------------
def _fused_kernel(x_ref, w1t_ref, b1_ref, w2_ref, b2_ref, o_ref, *, inv_hw):
    # x_ref / o_ref : (C, HW) slab for one image (input dtype)
    # w1t_ref : (C, R) = conv_reduce weight transposed (f32)
    # b1_ref  : (1, R) conv_reduce bias (f32)
    # w2_ref  : (C, R) = conv_expand weight (f32)
    # b2_ref  : (C, 1) conv_expand bias (f32)
    x = x_ref[...]

    # Global average pool (f32 accumulation), lane-axis reduction -> (C, 1).
    pooled = jnp.sum(x.astype(jnp.float32), axis=-1, keepdims=True) * inv_hw

    # conv_reduce (1x1) + ReLU:  h[r] = relu(sum_c w1[r,c] * pooled[c] + b1[r])
    h = jnp.sum(w1t_ref[...] * pooled, axis=0, keepdims=True) + b1_ref[...]  # (1, R)
    h = jnp.maximum(h, 0.0)

    # conv_expand (1x1):         s[c] = sum_r w2[c,r] * h[r] + b2[c]
    s = jnp.sum(w2_ref[...] * h, axis=-1, keepdims=True) + b2_ref[...]       # (C, 1)

    gate = jax.nn.sigmoid(s).astype(x.dtype)                                 # (C, 1)
    o_ref[...] = x * gate


# ---------------------------------------------------------------------------
# Fallback pass 1: tiled spatial-sum reduction (f32 accumulator output).
# ---------------------------------------------------------------------------
def _pool_kernel(x_ref, sum_ref, *, hw_total, needs_mask):
    # Grid: (row_blocks, hw_blocks); axis 1 (HW) is the reduction axis.
    j = pl.program_id(1)

    @pl.when(j == 0)
    def _():
        sum_ref[...] = jnp.zeros_like(sum_ref)

    if needs_mask:
        # Only the final HW block is partially out of bounds; keep the iota /
        # compare / select off the hot path for every other block.
        t_hw = x_ref.shape[-1]
        last = pl.num_programs(1) - 1

        @pl.when(j == last)
        def _():
            col = j * t_hw + jax.lax.broadcasted_iota(jnp.int32, (1, t_hw), 1)
            xv = jnp.where(col < hw_total, x_ref[...].astype(jnp.float32), 0.0)
            sum_ref[...] += jnp.sum(xv, axis=-1, keepdims=True)

        @pl.when(j != last)
        def _():
            sum_ref[...] += jnp.sum(
                x_ref[...].astype(jnp.float32), axis=-1, keepdims=True)
    else:
        sum_ref[...] += jnp.sum(
            x_ref[...].astype(jnp.float32), axis=-1, keepdims=True)


# ---------------------------------------------------------------------------
# Fallback pass 2: broadcast multiply in the input dtype (pure VPU).
# ---------------------------------------------------------------------------
def _scale_kernel(x_ref, gate_ref, o_ref):
    o_ref[...] = x_ref[...] * gate_ref[...]


def squeeze_excite(x, w1, b1, w2, b2, *, target_block_bytes=4 << 20,
                   force_two_pass=False):
    """SqueezeExcite forward.

    x: (N, C, H, W). w1: (R, C), b1: (R,)  (conv_reduce, 1x1, bias)
                      w2: (C, R), b2: (C,)  (conv_expand, 1x1, bias)
    """
    N, C, H, W = x.shape
    HW = H * W
    R = w1.shape[0]
    itemsize = jnp.dtype(x.dtype).itemsize

    w1f = w1.astype(jnp.float32)
    b1f = b1.astype(jnp.float32)
    w2f = w2.astype(jnp.float32)
    b2f = b2.astype(jnp.float32)

    # ---------------- fused single-pass path ----------------
    slab_in = C * HW * itemsize
    slab_f32 = C * HW * 4
    weight_bytes = 4 * (w1f.size + b1f.size + w2f.size + b2f.size)
    # double-buffered input + output slabs, one f32 working copy (+ mul temp),
    # resident weights, slack.
    fused_footprint = 4 * slab_in + 2 * slab_f32 + 2 * weight_bytes + (1 << 20)

    if (not force_two_pass) and fused_footprint <= _FUSED_VMEM_CAP:
        x3 = x.reshape(N, C, HW)
        kernel = functools.partial(_fused_kernel, inv_hw=1.0 / float(HW))
        out = pl.pallas_call(
            kernel,
            out_shape=jax.ShapeDtypeStruct((N, C, HW), x.dtype),
            grid_spec=pltpu.PrefetchScalarGridSpec(
                num_scalar_prefetch=0,
                grid=(N,),
                in_specs=[
                    pl.BlockSpec((None, C, HW), lambda n: (n, 0, 0)),
                    # Weight/bias blocks have a constant block index, so they
                    # are fetched once and stay resident across the whole grid.
                    pl.BlockSpec((C, R), lambda n: (0, 0)),
                    pl.BlockSpec((1, R), lambda n: (0, 0)),
                    pl.BlockSpec((C, R), lambda n: (0, 0)),
                    pl.BlockSpec((C, 1), lambda n: (0, 0)),
                ],
                out_specs=pl.BlockSpec((None, C, HW), lambda n: (n, 0, 0)),
            ),
            compiler_params=pltpu.CompilerParams(
                dimension_semantics=("parallel",),
                vmem_limit_bytes=_vmem_limit(fused_footprint + (8 << 20))),
        )(x3, w1f.T, b1f.reshape(1, R), w2f, b2f.reshape(C, 1))
        return out.reshape(N, C, H, W)

    # ---------------- fallback two-pass path (very large H*W) ----------------
    rows = N * C
    x2 = x.reshape(rows, HW)
    t_rows, t_hw = _pick_tiles(rows, HW, x.dtype, target_block_bytes)
    row_blocks = pl.cdiv(rows, t_rows)
    hw_blocks = pl.cdiv(HW, t_hw)

    tile_bytes = t_rows * t_hw * itemsize
    fb_footprint = 4 * tile_bytes + 2 * t_rows * t_hw * 4 + (2 << 20)
    fb_limit = _vmem_limit(fb_footprint)

    # pass 1: per-(n, c) spatial sums (tiled f32 reduction, HW axis last).
    pool = functools.partial(
        _pool_kernel, hw_total=HW, needs_mask=(HW % t_hw != 0))
    sums = pl.pallas_call(
        pool,
        out_shape=jax.ShapeDtypeStruct((rows, 1), jnp.float32),
        grid_spec=pltpu.PrefetchScalarGridSpec(
            num_scalar_prefetch=0,
            grid=(row_blocks, hw_blocks),
            in_specs=[pl.BlockSpec((t_rows, t_hw), lambda i, j: (i, j))],
            out_specs=pl.BlockSpec((t_rows, 1), lambda i, j: (i, 0)),
        ),
        compiler_params=pltpu.CompilerParams(
            dimension_semantics=("parallel", "arbitrary"),
            vmem_limit_bytes=fb_limit),
    )(x2)

    # gate (tiny batched matmul) hoisted out of the data loop, computed in f32.
    pooled = (sums[:, 0] / float(HW)).reshape(N, C)
    h = jnp.maximum(pooled @ w1f.T + b1f, 0.0)
    s = h @ w2f.T + b2f
    gate = jax.nn.sigmoid(s).astype(x.dtype).reshape(rows, 1)

    # pass 2: excite.  HW is the innermost grid axis so the gate block index is
    # unchanged between consecutive steps and is not re-DMA'd.
    out = pl.pallas_call(
        _scale_kernel,
        out_shape=jax.ShapeDtypeStruct((rows, HW), x.dtype),
        grid_spec=pltpu.PrefetchScalarGridSpec(
            num_scalar_prefetch=0,
            grid=(row_blocks, hw_blocks),
            in_specs=[
                pl.BlockSpec((t_rows, t_hw), lambda i, j: (i, j)),
                pl.BlockSpec((t_rows, 1), lambda i, j: (i, 0)),
            ],
            out_specs=pl.BlockSpec((t_rows, t_hw), lambda i, j: (i, j)),
        ),
        compiler_params=pltpu.CompilerParams(
            dimension_semantics=("parallel", "parallel"),
            vmem_limit_bytes=fb_limit),
    )(x2, gate)

    return out.reshape(N, C, H, W)


def _reference(x, w1, b1, w2, b2):
    pooled = jnp.mean(x, axis=(2, 3))                       # (N, C)
    h = jnp.maximum(pooled @ w1.T + b1, 0.0)                # (N, R)
    s = h @ w2.T + b2                                       # (N, C)
    gate = jax.nn.sigmoid(s)[:, :, None, None]
    return x * gate


if __name__ == "__main__":
    # SqueezeExcite(in_chs=4, se_ratio=0.25) -> reduced_chs = ceil(0.25*4) = 1
    N, C, H, W = 2, 4, 16, 16
    se_ratio = 0.25
    R = math.ceil(se_ratio * C)

    key = jax.random.PRNGKey(0)
    kx, k1, k2, k3, k4 = jax.random.split(key, 5)

    x = jax.random.normal(kx, (N, C, H, W), dtype=jnp.float32)
    # 1x1 conv weights are (out_chs, in_chs) after dropping the 1x1 spatial dims.
    w1 = jax.random.normal(k1, (R, C), dtype=jnp.float32) * 0.5   # conv_reduce weight
    b1 = jax.random.normal(k2, (R,), dtype=jnp.float32) * 0.1     # conv_reduce bias
    w2 = jax.random.normal(k3, (C, R), dtype=jnp.float32) * 0.5   # conv_expand weight
    b2 = jax.random.normal(k4, (C,), dtype=jnp.float32) * 0.1     # conv_expand bias

    ref = _reference(x, w1, b1, w2, b2)

    # Fused single-pass path (default).
    out = squeeze_excite(x, w1, b1, w2, b2)
    out = jax.block_until_ready(out)
    assert jnp.allclose(out, ref, atol=1e-5, rtol=1e-5), "fused path mismatch"

    # Fallback two-pass path (exercised explicitly for coverage).
    out2 = squeeze_excite(x, w1, b1, w2, b2, force_two_pass=True)
    out2 = jax.block_until_ready(out2)
    assert jnp.allclose(out2, ref, atol=1e-5, rtol=1e-5), "two-pass mismatch"

    print("KERNEL_OK")
</pallas_src>

<mosaic_0001>
module attributes {stable_mosaic.version = 11 : i64} {
  func.func @_fused_kernel(%arg0: i32, %arg1: memref<1x4x256xf32, #tpu.memory_space<vmem>>, %arg2: memref<4x1xf32, #tpu.memory_space<vmem>>, %arg3: memref<1x1xf32, #tpu.memory_space<vmem>>, %arg4: memref<4x1xf32, #tpu.memory_space<vmem>>, %arg5: memref<4x1xf32, #tpu.memory_space<vmem>>, %arg6: memref<1x4x256xf32, #tpu.memory_space<vmem>>) attributes {dimension_semantics = [#tpu.dimension_semantics<parallel>], iteration_bounds = array<i64: 2>, scalar_prefetch = 0 : i64, scratch_operands = 0 : i64, tpu.core_type = #tpu.core_type<tc>, window_params = [{transform_indices = @transform_0, window_bounds = array<i64: 1, 4, 256>}, {pipeline_mode = #tpu.pipeline_mode<synchronous>, transform_indices = @transform_1, window_bounds = array<i64: 4, 1>}, {pipeline_mode = #tpu.pipeline_mode<synchronous>, transform_indices = @transform_2, window_bounds = array<i64: 1, 1>}, {pipeline_mode = #tpu.pipeline_mode<synchronous>, transform_indices = @transform_3, window_bounds = array<i64: 4, 1>}, {pipeline_mode = #tpu.pipeline_mode<synchronous>, transform_indices = @transform_4, window_bounds = array<i64: 4, 1>}, {transform_indices = @transform_5, window_bounds = array<i64: 1, 4, 256>}]} {
    %c0 = arith.constant 0 : index
    %c0_0 = arith.constant 0 : index
    %c0_1 = arith.constant 0 : index
    %0 = vector.load %arg1[%c0, %c0_0, %c0_1] : memref<1x4x256xf32, #tpu.memory_space<vmem>>, vector<1x4x256xf32>
    %1 = vector.shape_cast %0 : vector<1x4x256xf32> to vector<4x256xf32>
    %cst = arith.constant dense<0.000000e+00> : vector<4xf32>
    %2 = vector.multi_reduction <add>, %1, %cst [1] : vector<4x256xf32> to vector<4xf32>
    %3 = vector.shape_cast %2 : vector<4xf32> to vector<4x1xf32>
    %cst_2 = arith.constant 3.906250e-03 : f32
    %4 = vector.broadcast %cst_2 : f32 to vector<4x1xf32>
    %5 = arith.mulf %3, %4 : vector<4x1xf32>
    %c0_3 = arith.constant 0 : index
    %c0_4 = arith.constant 0 : index
    %6 = vector.load %arg2[%c0_3, %c0_4] : memref<4x1xf32, #tpu.memory_space<vmem>>, vector<4x1xf32>
    %7 = arith.mulf %6, %5 : vector<4x1xf32>
    %cst_5 = arith.constant dense<0.000000e+00> : vector<1xf32>
    %8 = vector.multi_reduction <add>, %7, %cst_5 [0] : vector<4x1xf32> to vector<1xf32>
    %9 = vector.shape_cast %8 : vector<1xf32> to vector<1x1xf32>
    %c0_6 = arith.constant 0 : index
    %c0_7 = arith.constant 0 : index
    %10 = vector.load %arg3[%c0_6, %c0_7] : memref<1x1xf32, #tpu.memory_space<vmem>>, vector<1x1xf32>
    %11 = arith.addf %9, %10 : vector<1x1xf32>
    %cst_8 = arith.constant 0.000000e+00 : f32
    %12 = vector.broadcast %cst_8 : f32 to vector<1x1xf32>
    %13 = arith.maximumf %11, %12 : vector<1x1xf32>
    %c0_9 = arith.constant 0 : index
    %c0_10 = arith.constant 0 : index
    %14 = vector.load %arg4[%c0_9, %c0_10] : memref<4x1xf32, #tpu.memory_space<vmem>>, vector<4x1xf32>
    %15 = vector.broadcast %13 : vector<1x1xf32> to vector<4x1xf32>
    %16 = arith.mulf %14, %15 : vector<4x1xf32>
    %cst_11 = arith.constant dense<0.000000e+00> : vector<4xf32>
    %17 = vector.multi_reduction <add>, %16, %cst_11 [1] : vector<4x1xf32> to vector<4xf32>
    %18 = vector.shape_cast %17 : vector<4xf32> to vector<4x1xf32>
    %c0_12 = arith.constant 0 : index
    %c0_13 = arith.constant 0 : index
    %19 = vector.load %arg5[%c0_12, %c0_13] : memref<4x1xf32, #tpu.memory_space<vmem>>, vector<4x1xf32>
    %20 = arith.addf %18, %19 : vector<4x1xf32>
    %21 = arith.negf %20 : vector<4x1xf32>
    %22 = math.exp %21 : vector<4x1xf32>
    %cst_14 = arith.constant 1.000000e+00 : f32
    %23 = vector.broadcast %cst_14 : f32 to vector<4x1xf32>
    %24 = arith.addf %23, %22 : vector<4x1xf32>
    %25 = arith.divf %23, %24 : vector<4x1xf32>
    %26 = vector.broadcast %25 : vector<4x1xf32> to vector<4x256xf32>
    %27 = arith.mulf %1, %26 : vector<4x256xf32>
    %c0_15 = arith.constant 0 : index
    %c0_16 = arith.constant 0 : index
    %c0_17 = arith.constant 0 : index
    %28 = vector.load %arg6[%c0_15, %c0_16, %c0_17] : memref<1x4x256xf32, #tpu.memory_space<vmem>>, vector<1x4x256xf32>
    %29 = vector.shape_cast %28 : vector<1x4x256xf32> to vector<4x256xf32>
    %30 = vector.shape_cast %27 : vector<4x256xf32> to vector<1x4x256xf32>
    tpu.vector_store %arg6[%c0_15, %c0_16, %c0_17], %30 {strides = array<i32>} : memref<1x4x256xf32, #tpu.memory_space<vmem>>, vector<1x4x256xf32>,
    return
  }
  func.func @transform_0(%arg0: i32) -> (i32, i32, i32) {
    %c0_i32 = arith.constant 0 : i32
    %c0_i32_0 = arith.constant 0 : i32
    %c0_i32_1 = arith.constant 0 : i32
    return %arg0, %c0_i32, %c0_i32_0 : i32, i32, i32
  }
  func.func @transform_1(%arg0: i32) -> (i32, i32) {
    %c0_i32 = arith.constant 0 : i32
    %c0_i32_0 = arith.constant 0 : i32
    %c0_i32_1 = arith.constant 0 : i32
    return %c0_i32, %c0_i32_0 : i32, i32
  }
  func.func @transform_2(%arg0: i32) -> (i32, i32) {
    %c0_i32 = arith.constant 0 : i32
    %c0_i32_0 = arith.constant 0 : i32
    %c0_i32_1 = arith.constant 0 : i32
    return %c0_i32, %c0_i32_0 : i32, i32
  }
  func.func @transform_3(%arg0: i32) -> (i32, i32) {
    %c0_i32 = arith.constant 0 : i32
    %c0_i32_0 = arith.constant 0 : i32
    %c0_i32_1 = arith.constant 0 : i32
    return %c0_i32, %c0_i32_0 : i32, i32
  }
  func.func @transform_4(%arg0: i32) -> (i32, i32) {
    %c0_i32 = arith.constant 0 : i32
    %c0_i32_0 = arith.constant 0 : i32
    %c0_i32_1 = arith.constant 0 : i32
    return %c0_i32, %c0_i32_0 : i32, i32
  }
  func.func @transform_5(%arg0: i32) -> (i32, i32, i32) {
    %c0_i32 = arith.constant 0 : i32
    %c0_i32_0 = arith.constant 0 : i32
    %c0_i32_1 = arith.constant 0 : i32
    return %arg0, %c0_i32, %c0_i32_0 : i32, i32, i32
  }
}

</mosaic_0001>

<bundles_post_ra>
// kernel: tpu_custom_call.1
= control target key start
LH: loop header
LB: loop body
LE: loop exit
PB: predicated region body
PF: predicated region fallthrough
CT: control target
= control target key end

     0   :  { %s738_s0 = inlined_call_operand.hbm [shape: f32[2,4,256], index: 0, kind: input, shape index: {}]   ;;  %s739_s1 = inlined_call_operand.vmem [shape: f32[4,1], index: 1, kind: input, shape index: {}]   ;;  %s740_s2 = inlined_call_operand.<no memory space> [shape: f32[1,1], index: 2, kind: input, shape index: {}]   ;;  %s741_s3 = inlined_call_operand.vmem [shape: f32[4,1], index: 3, kind: input, shape index: {}]   ;;  %s742_s4 = inlined_call_operand.vmem [shape: f32[4,1], index: 4, kind: input, shape index: {}]   ;;  %s743_s5 = inlined_call_operand.hbm [shape: f32[2,4,256], index: 5, kind: output, shape index: {}]  }
   0x1   :  { %v10_v0 = vstv %s740_s2 }
   0x2   :  { %11 = vst [vmem:[#allocation2] sm:$0x1] %v10_v0 }
   0x3   :  { %12 = vsyncpa [#allocation4], 0 }
   0x4   :  { %14 = vsyncpa [#allocation4 + $0x1], 0 }
   0x5   :  { %15 = vsyncpa [#allocation5], 0 }
   0x6   :  { %17 = vsyncpa [#allocation5 + $0x1], 0  ;;  %s598_s20 = smov 0   ;;  %s600_s21 = smov 0  }
   0x7   :  { %s602_s22 = smov 0   ;;  %s604_s23 = smov 0  }
   0x8 LB: > { %s619_s2 = sadd.s32 4294967295, %s561_s23   ;;  %s395_s24 = sadd.s32 4294967294, %s561_s23   ;;  %s561_s23 = sphi %s604_s23, %s753_s23   ;;  %s557_s22 = sphi %s602_s22, %s752_s22   ;;  %s553_s21 = sphi %s600_s21, %s751_s21   ;;  %s549_s20 = sphi %s598_s20, %s750_s20  }
   0x9   : > { %s623_s25 = sadd.s32 1, %s561_s23   ;;  %s30_s26 = sadd.s32 1, %s557_s22 }
   0xa   : > { %s27_s27 = ssub.s32 %s561_s23, %s623_s25  ;;  %p37_p0 = scmp.ne.s32.totalorder %s557_s22, %s553_s21 }
   0xb   : > { %p28_p1 = scmp.eq.s32.totalorder %s27_s27, 0  ;;  %p38_p2 = scmp.eq.s32.totalorder %s561_s23, 0 }
   0xc   : > { %p43_p3 = scmp.ne.s32.totalorder %s553_s21, %s549_s20  ;;  %p44_p4 = scmp.eq.s32.totalorder %s619_s2, 0 }
   0xd   : > { %s635_s28 = scalar_select %p28_p1, %s557_s22, %s30_s26  }
   0xe   : > { %p637_p5 = por %p38_p2, %p37_p0  ;;  %p641_p6 = por %p44_p4, %p43_p3 }
   0xf   : > { %p151_p7 = scmp.eq.s32.totalorder %s619_s2, 1  ;;  %p157_p8 = scmp.eq.s32.totalorder %s395_s24, 1 }
  0x10   : > { %p424_p10 = scmp.lt.s32.totalorder %s561_s23, 2  ;;  %s189_s8 = sand.u32 1, %s557_s22  }
  0x11   : > { %p648_p11 = por %p151_p7, %p37_p0  ;;  %p652_p12 = por %p157_p8, %p43_p3 }
  0x12   : > { %s410_s9 = sshll.u32 %s561_s23, 3  ;;  %s398_s10 = sshll.u32 %s189_s8, 3 }
  0x13   : > { %s198_s13 = scalar_lea.hbm %s738_s0, %s410_s9  ;;  %s193_s15 = scalar_lea.vmem [#allocation3], %s398_s10 }
  0x14   : > { %s200_s14 = sshll.u32 %s198_s13, 4  ;;  %s202_s16 = sshll.u32 %s193_s15, 4  ;;  %s201_s14 = int_to_ptr.hbm [resolvable:$true] %s200_s14  ;;  %s203_s16 = int_to_ptr.vmem [resolvable:$true] %s202_s16 }
  0x15   : > { %p663_p13 = pnand %p424_p10, %p637_p5  ;;  %p401_p0 = scmp.ge.s32.totalorder %s561_s23, 1 }
  0x16   : > { %p207_p1 = scmp.lt.s32.totalorder %s561_s23, 3  ;;  %s190_s18 = scalar_lea.sflag [#allocation4], %s189_s8 }
  0x17   : > { %s465_s19 = sshra.s32 %s201_s14, 4  ;;  %p469_p3 = pneg %p663_p13  ;;  %s466_s19 = int_to_ptr.hbm [resolvable:$true] %s465_s19 }
  0x18   : > { %s467_s24 = scalar_lea.hbm %s466_s19, 8  ;;  %s472_s29 = scalar_lea.hbm %s738_s0, 16 }
  0x19   : > { %p468_p2 = scmp.ne.s32.totalorder %s466_s19, %s467_s24  ;;  %p473_p5 = scmp.lt.s32.totalorder %s466_s19, %s738_s0 }
  0x1a   : > { %p474_p8 = scmp.lt.s32.totalorder %s472_s29, %s467_s24 }
  0x1b   : > { %p470_p4 = pnand %p469_p3, %p468_p2 }
  0x1c   : > { %p475_p10 = por %p474_p8, %p473_p5 }
  0x1d   : > { %p471_p7 = pneg %p470_p4 }
  0x1f   : > { %p476_p9 = pnand %p475_p10, %p471_p7 }
  0x21   : > { %479 = shalt.err (!%p476_p9)
}
  0x22   : > { %419 = dma.hbm_to_vmem [thread:$0]  (!%p663_p13), %s201_s14, 128, %s203_s16, %s190_s18  }
  0x23   : > { %p208_p2 = pnand %p401_p0, %p207_p1 }
  0x24   : > { %s684_s8 = sand.u32 (!%p208_p2), 1, %s553_s21  }
  0x25   : > { %211 = sbr.rel (%p208_p2) target bundleno = 348 (0x15c), region = 40  ;;  %s402_s11 = sshll.u32 (!%p208_p2), %s684_s8, 3 }
  0x26   : > { %s214_s12 = scalar_lea.sflag (!%p208_p2), [#allocation4], %s684_s8  ;;  %s217_s13 = scalar_lea.vmem (!%p208_p2), [#allocation3], %s402_s11 }
  0x2a   : > { %540 = dma.done.wait (%p641_p6), %s214_s12, 128  }
  0x2b   : > { %542 = vsyncadd (%p641_p6), %s214_s12, 4294967168  ;;  %v245_v1 = vld [vmem:[%s217_s13] sm:$0xff]  ;;  %vm252_vm0 = vcmask 1043456   ;;  %v563_v7 = vmov 0   ;;  %v259_v8 = vld [vmem:[%s739_s1] sm:$0xf] }
  0x2c   : > { %247 = vst [vmem:[#allocation1] ss:$2 sm:$0xff] %v245_v1  ;;  %460 = vset.pattern.permute.xlu0 %v563_v7  ;;  %vm261_vm1 = vcmask 3072   ;;  %v269_v18 = vld [vmem:[#allocation2] sm:$0x1]  ;;  %s411_s19 = sshll.u32 %s619_s2, 3 }
  0x2d   : > { %v272_v22 = vld [vmem:[%s741_s3] sm:$0xf]  ;;  %v564_v40 = vmov 839922192   ;;  %s320_s27 = scalar_lea.hbm %s743_s5, %s411_s19  ;;  %s244_s29 = scalar_lea.vmem [#allocation6], %s402_s11 }
  0x2e   : > { %v276_v24 = vld [vmem:[%s742_s4] sm:$0xf]  ;;  %v302_v41 = vunpack.c.l.s4 %v564_v40  ;;  %s322_s9 = sshll.u32 %s244_s29, 4  ;;  %s324_s10 = sshll.u32 %s320_s27, 4  ;;  %s323_s9 = int_to_ptr.vmem [resolvable:$true] %s322_s9  ;;  %s325_s10 = int_to_ptr.hbm [resolvable:$true] %s324_s10 }
  0x2f   : > { %s309_s12 = scalar_lea.sflag [#allocation5], %s684_s8  ;;  %s509_s13 = sshra.s32 %s325_s10, 4  ;;  %s510_s13 = int_to_ptr.hbm [resolvable:$true] %s509_s13 }
  0x30   : > { %v303_v42 = vunpack.c.0.s8 %v302_v41  ;;  %s511_s2 = scalar_lea.hbm %s510_s13, 8  ;;  %s515_s30 = scalar_lea.hbm %s743_s5, 16 }
  0x31   : > { %p512_p6 = scmp.ne.s32.totalorder %s510_s13, %s511_s2  ;;  %p516_p0 = scmp.lt.s32.totalorder %s510_s13, %s743_s5 }
  0x32   : > { %p517_p1 = scmp.lt.s32.totalorder %s515_s30, %s511_s2 }
  0x33   : > { %v248_v2 = vld.sshfl [vmem:[#allocation1] sm:$0xff pattern:$0x75316420]  ;;  %v249_v3 = vld.sshfl [vmem:[#allocation1 + $0x8] sm:$0xff pattern:$0x75316420]  ;;  %p513_p9 = pnand %p512_p6, %p648_p11 }
  0x34   : > { %v253_v4 = vsel %vm252_vm0, %v248_v2, 0.0  ;;  %v254_v5 = vsel %vm252_vm0, %v249_v3, 0.0  ;;  %p518_p3 = por %p517_p1, %p516_p0 }
  0x35   : > { %v255_v6 = vadd.f32 %v254_v5, %v253_v4  ;;  %p514_p13 = pneg %p513_p9 }
  0x37   : > { %256 = vadd.xlane.f32.xlu0 %v255_v6  ;;  %p519_p4 = pnand %p518_p3, %p514_p13 }
  0xaa   : > { %v257_v9 = vpop.xlane.xlu0 %256 }
  0xab   : > { %v258_v10 = vmul.f32 0.00390625, %v257_v9 }
  0xad   : > { %v260_v11 = vmul.f32 %v259_v8, %v258_v10 }
  0xaf   : > { %v262_v12 = vsel %vm261_vm1, %v260_v11, 0.0 }
  0xb0   : > { %v263_v13 = vrot.slane %v262_v12, 4 }
  0xb2   : > { %v264_v14 = vadd.f32 %v263_v13, %v262_v12 }
  0xb4   : > { %v265_v15 = vrot.slane %v264_v14, 2 }
  0xb6   : > { %v266_v16 = vadd.f32 %v265_v15, %v264_v14 }
  0xb8   : > { %v267_v17 = vrot.slane %v266_v16, 1 }
  0xba   : > { %v268_v19 = vadd.f32 %v267_v17, %v266_v16 }
  0xbc   : > { %v270_v20 = vadd.f32 %v269_v18, %v268_v19 }
  0xbe   : > { %v271_v21 = vmax.f32 %v270_v20, 0.0 }
  0xc0   : > { %v273_v23 = vperm.slane %v271_v21, 0 }
  0xc2   : > { %v274_v25 = vmul.f32 %v273_v23, %v272_v22 }
  0xc4   : > { %v277_v26 = vadd.f32 %v276_v24, %v274_v25 }
  0xc6   : > { %v404_v27 = vmul.f32 -1.442695, %v277_v26 }
  0xc8   : > { %461 = vpow2.f32 %v404_v27 }
  0xce   : > { %v462_v28 = vpop.eup %461 }
  0xcf   : > { %v281_v29 = vadd.f32 1.0, %v462_v28 }
  0xd1   : > { %463 = vrcp.f32 %v281_v29  ;;  %v293_v33 = vand.u32 2147483648, %v281_v29  ;;  %v291_v35 = vand.u32 2147483647, %v281_v29  ;;  %vm287_vm3 = vweird.f32 %v281_v29 }
  0xd3   : > { %v294_v37 = vor.u32 1.1754944e-38, %v293_v33  ;;  %vm292_vm5 = vcmp.eq.f32.partialorder %v291_v35, 8.507059e+37 }
  0xd7   : > { %v464_v30 = vpop.eup %463 }
  0xd8   : > { %v283_v31 = vmul.f32 %v464_v30, %v281_v29  ;;  %vm288_vm2 = vweird.f32 %v464_v30 }
  0xd9   : > { %vm289_vm4 = vmor %vm287_vm3, %vm288_vm2 }
  0xda   : > { %v284_v32 = vsub.f32 1.0, %v283_v31 }
  0xdc   : > { %v285_v34 = vmul.f32 %v464_v30, %v284_v32 }
  0xde   : > { %v286_v36 = vadd.f32 %v464_v30, %v285_v34 }
  0xe0   : > { %v290_v38 = vsel %vm289_vm4, %v464_v30, %v286_v36 }
  0xe1   : > { %v295_v39 = vsel %vm292_vm5, %v294_v37, %v290_v38 }
  0xe2   : > { %299 = vperm.xlu0 %460, %v295_v39  }
 0x154   : > { %v300_v43 = vpop.permute.xlu0 %299 }
 0x155   : > { %v304_v44 = vperm.slane %v300_v43, %v303_v42 }
 0x157   : > { %v306_v45 = vmul.f32 %v304_v44, %v245_v1 }
 0x159   : > { %307 = vst [vmem:[%s244_s29] sm:$0xff] %v306_v45 }
 0x15a   : > { %522 = shalt.err (!%p519_p4)
}
 0x15b   : > { %414 = dma.vmem_to_hbm [thread:$0]  (%p648_p11), %s323_s9, 128, %s325_s10, %s309_s12  }
 0x15c PF: > { %s336_s8 = sand.u32 1, %s549_s20   ;;  %p749_p7 = scmp.ge.s32.totalorder %s561_s23, 2 }
 0x15d   : > { %s337_s17 = scalar_lea.sflag [#allocation5], %s336_s8 }
 0x15e   : > { %p421_p5 = pnand %p749_p7, %p652_p12 }
 0x160   : > { %p422_p8 = pneg %p421_p5 }
 0x162   : > { %544 = dma.done.wait (%p422_p8), %s337_s17, 128  }
 0x163   : > { %546 = vsyncadd (%p422_p8), %s337_s17, 4294967168  ;;  %p20_p10 = scmp.ge.s32.totalorder %s623_s25, 4   ;;  %s750_s20 = smov %s553_s21 }
 0x164   : > { %s751_s21 = smov %s557_s22  ;;  %s752_s22 = smov %s635_s28 }
 0x165   : > { %s753_s23 = smov %s623_s25  ;;  %22 = sbr.rel (!%p20_p10) target bundleno = 8 (0x8), region = 85 }
 0x16a   :  { %343 = vsyncpa [#allocation4], 1 }
 0x16b   :  { %345 = vsyncpa [#allocation4 + $0x1], 1 }
 0x16c   :  { %346 = vsyncpa [#allocation5], 1 }
 0x16d   :  { %348 = vsyncpa [#allocation5 + $0x1], 1 }

</bundles_post_ra>
